<compile_context>
chip_gen: v7x
topology: tpu7x:2x2x1
jax: 0.10.0
libtpu: 0.0.40
codegen_flags: <defaults>
</compile_context>

<pallas_src>
import jax
import jax.numpy as jnp
from jax.experimental import pallas as pl
from jax.experimental.pallas import tpu as pltpu


def _round_up(x: int, m: int) -> int:
    return (x + m - 1) // m * m


def _pick_batch_tile(batch, per_row_in_bytes, per_row_out_bytes,
                     resident_bytes, budget_bytes):
    """Largest batch tile (multiple of 8, <= padded batch) whose
    double-buffered working set fits the VMEM budget."""
    cap = _round_up(batch, 8)
    for tb in (512, 256, 128, 64, 32, 16, 8):
        if tb > cap:
            continue
        need = 2 * tb * (per_row_in_bytes + per_row_out_bytes) + resident_bytes
        if need <= budget_bytes:
            return tb
    return 8


def _classifier_kernel_avgpool(cls_ref, patch_ref, w_ref, b_ref, out_ref):
    # cls_ref:   [TB, n*D]      native dtype (bf16/f32) -- per-batch tile
    # patch_ref: [TB, N, D]     native dtype            -- per-batch tile
    # w_ref:     [n*D + D, Cp]  f32, resident across the whole grid
    # b_ref:     [1, Cp]        f32, resident
    # out_ref:   [TB, Cp]       f32
    cls_feat = cls_ref[...].astype(jnp.float32)          # in-vreg cast (cheap)
    patch = patch_ref[...].astype(jnp.float32)
    avg = jnp.mean(patch, axis=1)                        # f32 accumulation
    feat = jnp.concatenate([cls_feat, avg], axis=-1)     # [TB, n*D + D]
    out_ref[...] = (
        jnp.dot(feat, w_ref[...], preferred_element_type=jnp.float32)
        + b_ref[...])


def _classifier_kernel_nopool(cls_ref, w_ref, b_ref, out_ref):
    cls_feat = cls_ref[...].astype(jnp.float32)
    out_ref[...] = (
        jnp.dot(cls_feat, w_ref[...], preferred_element_type=jnp.float32)
        + b_ref[...])


def linear_classifier_forward(x_tokens_list, weight, bias, *, use_n_blocks,
                              use_avgpool, batch_tile=None,
                              vmem_budget_bytes=32 << 20):
    """JAX/Pallas equivalent of LinearClassifier.forward.

    x_tokens_list: list of (patch_tokens [B, N, D], class_token [B, D]) pairs.
    weight: [num_classes, out_dim] (PyTorch nn.Linear layout).
    bias:   [num_classes].
    """
    intermediate = x_tokens_list[-use_n_blocks:]
    # Class-token concat: pure layout, kept in NATIVE dtype (no f32 HBM copy).
    cls_feat = jnp.concatenate([ct for _, ct in intermediate], axis=-1)  # [B, n*D]
    B, nD = cls_feat.shape
    num_classes = weight.shape[0]
    c_pad = _round_up(num_classes, 128)   # lane-dense output / MXU N dim

    bias_p = jnp.pad(bias.astype(jnp.float32),
                     (0, c_pad - num_classes)).reshape(1, c_pad)

    compiler_params = pltpu.CompilerParams(
        dimension_semantics=("parallel",),
        vmem_limit_bytes=64 << 20)

    if use_avgpool:
        patch_last = intermediate[-1][0]              # [B, N, D], native dtype
        _, N, D = patch_last.shape
        K = nD + D
        assert weight.shape[1] == K, "out_dim mismatch"
        # Stack cls-part and avgpool-part of the weight into one [K, C_pad]
        # matrix (transposed so the kernel contracts over the last feature dim).
        w_full = jnp.pad(weight.T.astype(jnp.float32),
                         ((0, 0), (0, c_pad - num_classes)))

        per_row_in = (N * D * patch_last.dtype.itemsize
                      + nD * cls_feat.dtype.itemsize)
        per_row_out = c_pad * 4
        resident = K * c_pad * 4 + c_pad * 4
        if batch_tile is not None:
            tb = max(8, _round_up(int(batch_tile), 8))
        else:
            tb = _pick_batch_tile(B, per_row_in, per_row_out, resident,
                                  vmem_budget_bytes)
        b_pad = _round_up(B, tb)
        if b_pad != B:
            cls_feat = jnp.pad(cls_feat, ((0, b_pad - B), (0, 0)))
            patch_last = jnp.pad(patch_last, ((0, b_pad - B), (0, 0), (0, 0)))

        cost = pl.CostEstimate(
            flops=int(2 * b_pad * K * c_pad + b_pad * N * D),
            transcendentals=0,
            bytes_accessed=int(b_pad * (per_row_in + per_row_out) + resident))

        out = pl.pallas_call(
            _classifier_kernel_avgpool,
            out_shape=jax.ShapeDtypeStruct((b_pad, c_pad), jnp.float32),
            grid_spec=pltpu.PrefetchScalarGridSpec(
                num_scalar_prefetch=0,
                grid=(b_pad // tb,),
                in_specs=[
                    pl.BlockSpec((tb, nD), lambda i: (i, 0)),      # cls tile
                    pl.BlockSpec((tb, N, D), lambda i: (i, 0, 0)),  # patch tile
                    pl.BlockSpec((K, c_pad), lambda i: (0, 0)),     # weights (resident)
                    pl.BlockSpec((1, c_pad), lambda i: (0, 0)),     # bias (resident)
                ],
                out_specs=pl.BlockSpec((tb, c_pad), lambda i: (i, 0)),
            ),
            compiler_params=compiler_params,
            cost_estimate=cost,
        )(cls_feat, patch_last, w_full, bias_p)
    else:
        assert weight.shape[1] == nD, "out_dim mismatch"
        w_full = jnp.pad(weight.T.astype(jnp.float32),
                         ((0, 0), (0, c_pad - num_classes)))

        per_row_in = nD * cls_feat.dtype.itemsize
        per_row_out = c_pad * 4
        resident = nD * c_pad * 4 + c_pad * 4
        if batch_tile is not None:
            tb = max(8, _round_up(int(batch_tile), 8))
        else:
            tb = _pick_batch_tile(B, per_row_in, per_row_out, resident,
                                  vmem_budget_bytes)
        b_pad = _round_up(B, tb)
        if b_pad != B:
            cls_feat = jnp.pad(cls_feat, ((0, b_pad - B), (0, 0)))

        cost = pl.CostEstimate(
            flops=int(2 * b_pad * nD * c_pad),
            transcendentals=0,
            bytes_accessed=int(b_pad * (per_row_in + per_row_out) + resident))

        out = pl.pallas_call(
            _classifier_kernel_nopool,
            out_shape=jax.ShapeDtypeStruct((b_pad, c_pad), jnp.float32),
            grid_spec=pltpu.PrefetchScalarGridSpec(
                num_scalar_prefetch=0,
                grid=(b_pad // tb,),
                in_specs=[
                    pl.BlockSpec((tb, nD), lambda i: (i, 0)),
                    pl.BlockSpec((nD, c_pad), lambda i: (0, 0)),
                    pl.BlockSpec((1, c_pad), lambda i: (0, 0)),
                ],
                out_specs=pl.BlockSpec((tb, c_pad), lambda i: (i, 0)),
            ),
            compiler_params=compiler_params,
            cost_estimate=cost,
        )(cls_feat, w_full, bias_p)

    # Slice off batch padding and class padding (pure layout in the wrapper).
    return out[:B, :num_classes]


def _reference(x_tokens_list, weight, bias, *, use_n_blocks, use_avgpool):
    intermediate = x_tokens_list[-use_n_blocks:]
    out = jnp.concatenate([ct for _, ct in intermediate], axis=-1)
    if use_avgpool:
        out = jnp.concatenate(
            [out, jnp.mean(intermediate[-1][0], axis=1)], axis=-1)
    out = out.astype(jnp.float32)
    return out @ weight.T.astype(jnp.float32) + bias.astype(jnp.float32)


def _run_case(key, *, dtype, use_avgpool, tol):
    # Small synthetic configuration consistent with the module's forward.
    B, N, D = 2, 8, 32          # batch, patch tokens, embed dim
    n_total_blocks = 4
    use_n_blocks = 2
    num_classes = 16
    out_dim = (use_n_blocks + int(use_avgpool)) * D  # matches create_linear_input

    keys = jax.random.split(key, 2 * n_total_blocks + 1)
    x_tokens_list = []
    for i in range(n_total_blocks):
        patch = jax.random.normal(keys[2 * i], (B, N, D),
                                  dtype=jnp.float32).astype(dtype)
        cls = jax.random.normal(keys[2 * i + 1], (B, D),
                                dtype=jnp.float32).astype(dtype)
        x_tokens_list.append((patch, cls))

    # nn.Linear(out_dim, num_classes) init: weight ~ N(0, 0.01), bias = 0.
    weight = 0.01 * jax.random.normal(keys[-1], (num_classes, out_dim),
                                      dtype=jnp.float32)
    bias = jnp.zeros((num_classes,), dtype=jnp.float32)

    out = linear_classifier_forward(
        x_tokens_list, weight, bias,
        use_n_blocks=use_n_blocks, use_avgpool=use_avgpool)
    out = jax.block_until_ready(out)

    ref = _reference(x_tokens_list, weight, bias,
                     use_n_blocks=use_n_blocks, use_avgpool=use_avgpool)
    assert out.shape == (B, num_classes)
    err = float(jnp.max(jnp.abs(out - ref)))
    assert jnp.allclose(out, ref, atol=tol, rtol=tol), (
        f"mismatch (dtype={dtype}, avgpool={use_avgpool}): max_abs_err={err}")


if __name__ == "__main__":
    key = jax.random.PRNGKey(0)
    k1, k2, k3 = jax.random.split(key, 3)
    # f32 activations (exact match to the .float() reference path).
    _run_case(k1, dtype=jnp.float32, use_avgpool=True, tol=1e-4)
    _run_case(k2, dtype=jnp.float32, use_avgpool=False, tol=1e-4)
    # bf16 activations: DMA'd in bf16, up-cast to f32 only inside the kernel
    # (f32-accumulated mean -> slightly more accurate than the bf16 reference).
    _run_case(k3, dtype=jnp.bfloat16, use_avgpool=True, tol=2e-2)
    print("KERNEL_OK")
</pallas_src>

<mosaic_0001>
module attributes {stable_mosaic.version = 11 : i64} {
  func.func @_classifier_kernel_avgpool(%arg0: i32, %arg1: memref<8x64xf32, #tpu.memory_space<vmem>>, %arg2: memref<8x8x32xf32, #tpu.memory_space<vmem>>, %arg3: memref<96x128xf32, #tpu.memory_space<vmem>>, %arg4: memref<1x128xf32, #tpu.memory_space<vmem>>, %arg5: memref<8x128xf32, #tpu.memory_space<vmem>>) attributes {dimension_semantics = [#tpu.dimension_semantics<parallel>], iteration_bounds = array<i64: 1>, scalar_prefetch = 0 : i64, scratch_operands = 0 : i64, tpu.core_type = #tpu.core_type<tc>, window_params = [{transform_indices = @transform_0, window_bounds = array<i64: 8, 64>}, {transform_indices = @transform_1, window_bounds = array<i64: 8, 8, 32>}, {pipeline_mode = #tpu.pipeline_mode<synchronous>, transform_indices = @transform_2, window_bounds = array<i64: 96, 128>}, {pipeline_mode = #tpu.pipeline_mode<synchronous>, transform_indices = @transform_3, window_bounds = array<i64: 1, 128>}, {transform_indices = @transform_4, window_bounds = array<i64: 8, 128>}]} {
    %c0 = arith.constant 0 : index
    %c0_0 = arith.constant 0 : index
    %0 = vector.load %arg1[%c0, %c0_0] : memref<8x64xf32, #tpu.memory_space<vmem>>, vector<8x64xf32>
    %c0_1 = arith.constant 0 : index
    %c0_2 = arith.constant 0 : index
    %c0_3 = arith.constant 0 : index
    %1 = vector.load %arg2[%c0_1, %c0_2, %c0_3] : memref<8x8x32xf32, #tpu.memory_space<vmem>>, vector<8x8x32xf32>
    %cst = arith.constant dense<0.000000e+00> : vector<8x32xf32>
    %2 = vector.multi_reduction <add>, %1, %cst [1] : vector<8x8x32xf32> to vector<8x32xf32>
    %cst_4 = arith.constant 8.000000e+00 : f32
    %3 = vector.broadcast %cst_4 : f32 to vector<8x32xf32>
    %4 = arith.divf %2, %3 : vector<8x32xf32>
    %5 = tpu.concatenate %0, %4 in 1 : vector<8x64xf32>, vector<8x32xf32> -> vector<8x96xf32>
    %c0_5 = arith.constant 0 : index
    %c0_6 = arith.constant 0 : index
    %6 = vector.load %arg3[%c0_5, %c0_6] : memref<96x128xf32, #tpu.memory_space<vmem>>, vector<96x128xf32>
    %cst_7 = arith.constant dense<0.000000e+00> : vector<8x128xf32>
    %7 = tpu.matmul %5, %6, %cst_7 {dimension_numbers = #tpu.dot_dimension_numbers<[1], [0], [0], [1], [0, 0, 1, 1], [], []>} : vector<8x96xf32>, vector<96x128xf32>, vector<8x128xf32> -> vector<8x128xf32>
    %c0_8 = arith.constant 0 : index
    %c0_9 = arith.constant 0 : index
    %8 = vector.load %arg4[%c0_8, %c0_9] : memref<1x128xf32, #tpu.memory_space<vmem>>, vector<1x128xf32>
    %9 = vector.broadcast %8 : vector<1x128xf32> to vector<8x128xf32>
    %10 = arith.addf %7, %9 : vector<8x128xf32>
    %c0_10 = arith.constant 0 : index
    %c0_11 = arith.constant 0 : index
    %11 = vector.load %arg5[%c0_10, %c0_11] : memref<8x128xf32, #tpu.memory_space<vmem>>, vector<8x128xf32>
    tpu.vector_store %arg5[%c0_10, %c0_11], %10 {strides = array<i32>} : memref<8x128xf32, #tpu.memory_space<vmem>>, vector<8x128xf32>,
    return
  }
  func.func @transform_0(%arg0: i32) -> (i32, i32) {
    %c0_i32 = arith.constant 0 : i32
    %c0_i32_0 = arith.constant 0 : i32
    return %arg0, %c0_i32 : i32, i32
  }
  func.func @transform_1(%arg0: i32) -> (i32, i32, i32) {
    %c0_i32 = arith.constant 0 : i32
    %c0_i32_0 = arith.constant 0 : i32
    %c0_i32_1 = arith.constant 0 : i32
    return %arg0, %c0_i32, %c0_i32_0 : i32, i32, i32
  }
  func.func @transform_2(%arg0: i32) -> (i32, i32) {
    %c0_i32 = arith.constant 0 : i32
    %c0_i32_0 = arith.constant 0 : i32
    %c0_i32_1 = arith.constant 0 : i32
    return %c0_i32, %c0_i32_0 : i32, i32
  }
  func.func @transform_3(%arg0: i32) -> (i32, i32) {
    %c0_i32 = arith.constant 0 : i32
    %c0_i32_0 = arith.constant 0 : i32
    %c0_i32_1 = arith.constant 0 : i32
    return %c0_i32, %c0_i32_0 : i32, i32
  }
  func.func @transform_4(%arg0: i32) -> (i32, i32) {
    %c0_i32 = arith.constant 0 : i32
    %c0_i32_0 = arith.constant 0 : i32
    return %arg0, %c0_i32 : i32, i32
  }
}

</mosaic_0001>

<bundles_post_ra>
// kernel: tpu_custom_call.1
= control target key start
LH: loop header
LB: loop body
LE: loop exit
PB: predicated region body
PF: predicated region fallthrough
CT: control target
= control target key end

     0   :  { %9 = vsyncpa [#allocation3], 0  ;;  %s592_s0 = inlined_call_operand.hbm [shape: f32[8,64], index: 0, kind: input, shape index: {}]   ;;  %s593_s1 = inlined_call_operand.hbm [shape: f32[8,8,32], index: 1, kind: input, shape index: {}]   ;;  %s594_s2 = inlined_call_operand.hbm [shape: f32[96,128], index: 2, kind: input, shape index: {}]   ;;  %s595_s3 = inlined_call_operand.hbm [shape: f32[1,128], index: 3, kind: input, shape index: {}]   ;;  %s596_s4 = inlined_call_operand.hbm [shape: f32[8,128], index: 4, kind: output, shape index: {}]  }
   0x1   :  { %10 = vsyncpa [#allocation6], 0 }
   0x2   :  { %11 = vsyncpa [#allocation9], 0 }
   0x3   :  { %12 = vsyncpa [#allocation4], 0  ;;  %s471_s15 = smov [#allocation5]   ;;  %s353_s19 = scalar_lea.hbm %s593_s1, 1024 }
   0x4   :  { %s28_s16 = sshll.u32 %s471_s15, 4  ;;  %p354_p0 = scmp.ne.s32.totalorder %s593_s1, %s353_s19  ;;  %s29_s16 = int_to_ptr.vmem [resolvable:$true] %s28_s16 }
   0x5   :  { %p357_p1 = scmp.lt.u32.totalorder %s353_s19, %s593_s1 }
   0x7   :  { %p359_p2 = pnand %p357_p1, %p354_p0 }
   0x9   :  { %362 = shalt.err (!%p359_p2)
}
   0xa   :  { %s363_s24 = scalar_lea.vmem %s29_s16, 1024  ;;  %p368_p4 = scmp.lt.s32.totalorder %s29_s16, %s29_s16 }
   0xb   :  { %p364_p3 = scmp.ne.s32.totalorder %s29_s16, %s363_s24  ;;  %p369_p5 = scmp.lt.s32.totalorder %s363_s24, %s363_s24 }
   0xd   :  { %p370_p6 = por %p369_p5, %p368_p4 }
   0xf   :  { %p371_p7 = pnand %p370_p6, %p364_p3 }
  0x11   :  { %374 = shalt.err (!%p371_p7)
}
  0x12   :  { %s472_s25 = smov 128   ;;  %s473_s26 = smov 8  }
  0x13   :  { %34 = dma.hbm_to_vmem [thread:$0]  %s593_s1, 1024, %s29_s16, [#allocation6], %s472_s25, %s472_s25, %s473_s26  }
  0x14   :  { %s474_s29 = smov [#allocation2]   ;;  %s475_s5 = smov [#allocation7]  }
  0x15   :  { %s19_s30 = sshll.u32 %s474_s29, 4  ;;  %s40_s6 = sshll.u32 %s475_s5, 4  ;;  %s20_s30 = int_to_ptr.vmem [resolvable:$true] %s19_s30  ;;  %s41_s6 = int_to_ptr.vmem [resolvable:$true] %s40_s6 }
  0x16   :  { %s375_s9 = scalar_lea.hbm %s592_s0, 128 }
  0x17   :  { %p376_p8 = scmp.ne.s32.totalorder %s592_s0, %s375_s9  ;;  %p379_p9 = scmp.lt.u32.totalorder %s375_s9, %s592_s0 }
  0x19   :  { %p381_p10 = pnand %p379_p9, %p376_p8 }
  0x1b   :  { %384 = shalt.err (!%p381_p10)
}
  0x1c   :  { %s385_s1 = scalar_lea.vmem %s20_s30, 128  ;;  %p390_p12 = scmp.lt.s32.totalorder %s20_s30, %s20_s30 }
  0x1d   :  { %p386_p11 = scmp.ne.s32.totalorder %s20_s30, %s385_s1  ;;  %p391_p13 = scmp.lt.s32.totalorder %s385_s1, %s385_s1 }
  0x1f   :  { %p392_p0 = por %p391_p13, %p390_p12 }
  0x21   :  { %p393_p1 = pnand %p392_p0, %p386_p11 }
  0x23   :  { %396 = shalt.err (!%p393_p1)
}
  0x24   :  { %22 = dma.hbm_to_vmem [thread:$0]  %s592_s0, 128, %s20_s30, [#allocation3]  }
  0x25   :  { %s397_s18 = scalar_lea.hbm %s594_s2, 1536 }
  0x26   :  { %p398_p2 = scmp.ne.s32.totalorder %s594_s2, %s397_s18  ;;  %p401_p3 = scmp.lt.u32.totalorder %s397_s18, %s594_s2 }
  0x28   :  { %p403_p4 = pnand %p401_p3, %p398_p2 }
  0x2a   :  { %406 = shalt.err (!%p403_p4)
}
  0x2b   :  { %s407_s23 = scalar_lea.vmem %s41_s6, 1536  ;;  %p412_p6 = scmp.lt.s32.totalorder %s41_s6, %s41_s6 }
  0x2c   :  { %p408_p5 = scmp.ne.s32.totalorder %s41_s6, %s407_s23  ;;  %p413_p7 = scmp.lt.s32.totalorder %s407_s23, %s407_s23 }
  0x2e   :  { %p414_p8 = por %p413_p7, %p412_p6 }
  0x30   :  { %p415_p9 = pnand %p414_p8, %p408_p5 }
  0x32   :  { %418 = shalt.err (!%p415_p9)
}
  0x33   :  { %46 = dma.hbm_to_vmem [thread:$0]  %s594_s2, 1536, %s41_s6, [#allocation6], %s472_s25, %s472_s25, %s473_s26  }
  0x34   :  { %s476_s27 = smov [#allocation8]   ;;  %s419_s5 = scalar_lea.hbm %s595_s3, 16 }
  0x35   :  { %s53_s28 = sshll.u32 %s476_s27, 4  ;;  %p420_p10 = scmp.ne.s32.totalorder %s595_s3, %s419_s5  ;;  %s54_s28 = int_to_ptr.vmem [resolvable:$true] %s53_s28 }
  0x36   :  { %p423_p11 = scmp.lt.u32.totalorder %s419_s5, %s595_s3 }
  0x38   :  { %p425_p12 = pnand %p423_p11, %p420_p10 }
  0x3a   :  { %428 = shalt.err (!%p425_p12)
}
  0x3b   :  { %s429_s11 = scalar_lea.vmem %s54_s28, 16  ;;  %s433_s2 = scalar_lea.vmem %s54_s28, 32 }
  0x3c   :  { %p430_p13 = scmp.ne.s32.totalorder %s54_s28, %s429_s11  ;;  %p434_p0 = scmp.lt.s32.totalorder %s54_s28, %s54_s28 }
  0x3d   :  { %p435_p1 = scmp.lt.s32.totalorder %s433_s2, %s429_s11 }
  0x3f   :  { %p436_p2 = por %p435_p1, %p434_p0 }
  0x41   :  { %p437_p3 = pnand %p436_p2, %p430_p13 }
  0x43   :  { %440 = shalt.err (!%p437_p3)
}
  0x44   :  { %56 = dma.hbm_to_vmem [thread:$0]  %s595_s3, 16, %s54_s28, [#allocation9]  }
  0x45   :  { %463 = dma.done.wait [#allocation3], 128  }
  0x46   :  { %464 = vsyncadd [#allocation3], 4294967168 }
  0x47   :  { %465 = dma.done.wait [#allocation6], 2560  }
  0x48   :  { %466 = vsyncadd [#allocation6], 4294964736 }
  0x49   :  { %467 = dma.done.wait [#allocation9], 16  }
  0x4a   :  { %468 = vsyncadd [#allocation9], 4294967280  ;;  %v477_v0 = vmov 0.0|0.0   ;;  %vm78_vm0 = vcmask 261120   ;;  %v70_v1 = vld [vmem:[#allocation5] sm:$0xff]  ;;  %v71_v2 = vld [vmem:[#allocation5 + $0x8] sm:$0xff] }
  0x4b   :  { %324 = vmatprep.subr.bf16.mxu0 %v477_v0  ;;  %v72_v3 = vld [vmem:[#allocation5 + $0x10] sm:$0xff]  ;;  %v73_v4 = vld [vmem:[#allocation5 + $0x18] sm:$0xff]  ;;  %v74_v5 = vld [vmem:[#allocation5 + $0x20] sm:$0xff]  ;;  %v79_v7 = vsel %vm78_vm0, %v70_v1, 0.0  ;;  %v86_v8 = vsel %vm78_vm0, %v71_v2, 0.0  ;;  %vm152_vm1 = vcmask 1041409  }
  0x4c   :  { %v75_v6 = vld [vmem:[#allocation5 + $0x28] sm:$0xff]  ;;  %v93_v9 = vsel %vm78_vm0, %v72_v3, 0.0  ;;  %v76_v10 = vld [vmem:[#allocation5 + $0x30] sm:$0xff]  ;;  %v77_v11 = vld [vmem:[#allocation5 + $0x38] sm:$0xff]  ;;  %v80_v12 = vrot.slane %v79_v7, 4  ;;  %v87_v13 = vrot.slane %v86_v8, 4 }
  0x4d   :  { %v94_v14 = vrot.slane %v93_v9, 4  ;;  %v100_v15 = vsel %vm78_vm0, %v73_v4, 0.0  ;;  %v107_v17 = vsel %vm78_vm0, %v74_v5, 0.0  ;;  %v114_v18 = vsel %vm78_vm0, %v75_v6, 0.0  ;;  %v171_v60 = vld [vmem:[#allocation7] sm:$0xff]  ;;  %v172_v61 = vld [vmem:[#allocation7 + $0x8] sm:$0xff] }
  0x4e   :  { %v101_v16 = vrot.slane %v100_v15, 4  ;;  %v121_v19 = vsel %vm78_vm0, %v76_v10, 0.0  ;;  %v81_v20 = vadd.f32 %v80_v12, %v79_v7  ;;  %v88_v21 = vadd.f32 %v87_v13, %v86_v8  ;;  %v173_v7 = vld [vmem:[#allocation7 + $0x10] sm:$0xff]  ;;  %v174_v8 = vld [vmem:[#allocation7 + $0x18] sm:$0xff]  ;;  %s480_s3 = smov 64   ;;  %s481_s6 = smov [#allocation10]  }
  0x4f   :  { %v95_v22 = vadd.f32 %v94_v14, %v93_v9  ;;  %v108_v23 = vrot.slane %v107_v17, 4  ;;  %v115_v25 = vrot.slane %v114_v18, 4  ;;  %v122_v26 = vrot.slane %v121_v19, 4  ;;  %s271_s12 = sshll.u32 %s481_s6, 4  ;;  %s272_s12 = int_to_ptr.vmem [resolvable:$true] %s271_s12 }
  0x50   :  { %v102_v24 = vadd.f32 %v101_v16, %v100_v15  ;;  %v128_v27 = vsel %vm78_vm0, %v77_v11, 0.0  ;;  %v82_v28 = vrot.slane %v81_v20, 2  ;;  %v89_v29 = vrot.slane %v88_v21, 2  ;;  %s441_s13 = scalar_lea.vmem %s272_s12, 128  ;;  %p446_p5 = scmp.lt.s32.totalorder %s272_s12, %s272_s12 }
  0x51   :  { %v96_v30 = vrot.slane %v95_v22, 2  ;;  %v109_v31 = vadd.f32 %v108_v23, %v107_v17  ;;  %vm154_vm2 = vcmask 1042434   ;;  %v116_v33 = vadd.f32 %v115_v25, %v114_v18  ;;  %p442_p4 = scmp.ne.s32.totalorder %s272_s12, %s441_s13  ;;  %p447_p6 = scmp.lt.s32.totalorder %s441_s13, %s441_s13 }
  0x52   :  { %v103_v32 = vrot.slane %v102_v24, 2  ;;  %v123_v34 = vadd.f32 %v122_v26, %v121_v19  ;;  %v129_v35 = vrot.slane %v128_v27, 4  ;;  %vm156_vm3 = vcmask 1043459  }
  0x53   :  { %v83_v36 = vadd.f32 %v82_v28, %v81_v20  ;;  %v90_v37 = vadd.f32 %v89_v29, %v88_v21  ;;  %v97_v38 = vadd.f32 %v96_v30, %v95_v22  ;;  %v110_v39 = vrot.slane %v109_v31, 2  ;;  %v175_v20 = vld [vmem:[#allocation7 + $0x20] sm:$0xff]  ;;  %v176_v21 = vld [vmem:[#allocation7 + $0x28] sm:$0xff]  ;;  %v178_v28 = vld [vmem:[#allocation7 + $0x38] sm:$0xff]  ;;  %p448_p7 = por %p447_p6, %p446_p5 }
  0x54   :  { %vm158_vm4 = vcmask 1044484   ;;  %v104_v40 = vadd.f32 %v103_v32, %v102_v24  ;;  %v117_v41 = vrot.slane %v116_v33, 2  ;;  %v124_v42 = vrot.slane %v123_v34, 2  ;;  %v179_v30 = vld [vmem:[#allocation7 + $0x40] sm:$0xff] }
  0x55   :  { %v130_v43 = vadd.f32 %v129_v35, %v128_v27  ;;  %v84_v44 = vrot.slane %v83_v36, 1  ;;  %v91_v45 = vrot.slane %v90_v37, 1  ;;  %v98_v46 = vrot.slane %v97_v38, 1  ;;  %v177_v27 = vld [vmem:[#allocation7 + $0x30] sm:$0xff]  ;;  %p449_p8 = pnand %p448_p7, %p442_p4 }
  0x56   :  { %v111_v47 = vadd.f32 %v110_v39, %v109_v31  ;;  %v105_v48 = vrot.slane %v104_v40, 1  ;;  %v118_v49 = vadd.f32 %v117_v41, %v116_v33  ;;  %v125_v50 = vadd.f32 %v124_v42, %v123_v34  ;;  %v180_v31 = vld [vmem:[#allocation7 + $0x48] sm:$0xff]  ;;  %v181_v33 = vld [vmem:[#allocation7 + $0x50] sm:$0xff]  ;;  %v182_v34 = vld [vmem:[#allocation7 + $0x58] sm:$0xff] }
  0x57   :  { %v131_v51 = vrot.slane %v130_v43, 2  ;;  %v85_v52 = vadd.f32 %v84_v44, %v83_v36  ;;  %v92_v53 = vadd.f32 %v91_v45, %v90_v37  ;;  %v99_v54 = vadd.f32 %v98_v46, %v97_v38  ;;  %v69_v36 = vld [vmem:[#allocation2] sm:$0xff]  ;;  %v282_v39 = vld [vmem:[#allocation8] ss:$0 sm:$0xff] }
  0x58   :  { %v112_v55 = vrot.slane %v111_v47, 1  ;;  %v106_v56 = vadd.f32 %v105_v48, %v104_v40  ;;  %v119_v57 = vrot.slane %v118_v49, 1  ;;  %v126_v58 = vrot.slane %v125_v50, 1 }
  0x59   :  { %v132_v59 = vadd.f32 %v131_v51, %v130_v43  ;;  %v136_v63 = vmul.f32 0.125, %v85_v52  ;;  %v137_v1 = vmul.f32 0.125, %v92_v53  ;;  %v138_v2 = vmul.f32 0.125, %v99_v54 }
  0x5a   :  { %v113_v62 = vadd.f32 %v112_v55, %v111_v47  ;;  %v120_v3 = vadd.f32 %v119_v57, %v118_v49  ;;  %v127_v4 = vadd.f32 %v126_v58, %v125_v50  ;;  %v139_v6 = vmul.f32 0.125, %v106_v56 }
  0x5b   :  { %v133_v5 = vrot.slane %v132_v59, 1  ;;  %v153_v10 = vsel %vm152_vm1, %v137_v1, %v136_v63  ;;  %vm160_vm5 = vcmask 1045509   ;;  %v325_v11 = vpack.c.bf16 %v172_v61, %v171_v60 }
  0x5c   :  { %v140_v9 = vmul.f32 0.125, %v113_v62  ;;  %v141_v13 = vmul.f32 0.125, %v120_v3  ;;  %v142_v14 = vmul.f32 0.125, %v127_v4  ;;  %v155_v15 = vsel %vm154_vm2, %v138_v2, %v153_v10 }
  0x5d   :  { %v134_v12 = vadd.f32 %v133_v5, %v132_v59  ;;  %v157_v16 = vsel %vm156_vm3, %v139_v6, %v155_v15  ;;  %vm162_vm6 = vcmask 1046534   ;;  %326 = vmatpush3.bf16.msra.mxu0 %v325_v11  ;;  %v328_v17 = vpack.c.bf16 %v174_v8, %v173_v7 }
  0x5e   :  { %v159_v19 = vsel %vm158_vm4, %v140_v9, %v157_v16  ;;  %vm164_vm7 = vcmask 1047559   ;;  %327 = vmatprep.subr.bf16.mxu0 %v477_v0  ;;  %vm478_vm8 = vmmov 0   ;;  %v479_v24 = vmov 0.0  }
  0x5f   :  { %v143_v18 = vmul.f32 0.125, %v134_v12  ;;  %v161_v22 = vsel %vm160_vm5, %v141_v13, %v159_v19  ;;  %321 = vmatprep.mubr.msk.f32.mxu0 %vm478_vm8, %v479_v24  ;;  %v331_v26 = vpack.c.bf16 %v176_v21, %v175_v20  ;;  %v334_v29 = vpack.c.bf16 %v178_v28, %v177_v27 }
  0x60   :  { %v163_v23 = vsel %vm162_vm6, %v142_v14, %v161_v22  ;;  %v337_v32 = vpack.c.bf16 %v180_v31, %v179_v30  ;;  %v340_v35 = vpack.c.bf16 %v182_v34, %v181_v33  ;;  %vm169_vm9 = vcmask 523264  }
  0x61   :  { %v165_v25 = vsel %vm164_vm7, %v143_v18, %v163_v23  ;;  %329 = vmatpush3.bf16.msra.mxu0 %v328_v17  ;;  %vm190_vm10 = vcmask 785408  }
  0x62   :  { %166 = vrot.lane.b32.xlu0 %v165_v25, %s480_s3  ;;  %330 = vmatprep.subr.bf16.mxu0 %v477_v0 }
  0x65   :  { %332 = vmatpush3.bf16.msra.mxu0 %v331_v26 }
  0x66   :  { %333 = vmatprep.subr.bf16.mxu0 %v477_v0 }
  0x69   :  { %335 = vmatpush3.bf16.msra.mxu0 %v334_v29 }
  0x6a   :  { %336 = vmatprep.subr.bf16.mxu0 %v477_v0 }
  0x6d   :  { %338 = vmatpush3.bf16.msra.mxu0 %v337_v32 }
  0x6e   :  { %339 = vmatprep.subr.bf16.mxu0 %v477_v0 }
  0x71   :  { %341 = vmatpush3.bf16.msra.mxu0 %v340_v35 }
  0xd4   :  { %v167_v37 = vpop.permute.xlu0 %166 }
  0xd5   :  { %v170_v38 = vsel %vm169_vm9, %v69_v36, %v167_v37 }
  0xd6   :  { %322 = vmatmul.mubr.msk.f32.vlgmr.msra.gmra.mrb[0].mxu0 %vm190_vm10, %v170_v38 }
 0x1a9   :  { %v260_v40 = vpop.f32.mrb[0].mxu0 }
 0x1aa   :  { %v261_v41 = vadd.f32 %v282_v39, %v260_v40  ;;  %v323_v42 = vpop.f32.mrb[1].mxu0 }
 0x1ac   :  { %264 = vst [vmem:[#allocation10] sm:$0xff] %v261_v41 }
 0x1ad   :  { %452 = shalt.err (!%p449_p8)
}
 0x1ae   :  { %s453_s15 = scalar_lea.hbm %s596_s4, 128 }
 0x1af   :  { %p454_p9 = scmp.ne.s32.totalorder %s596_s4, %s453_s15  ;;  %p457_p10 = scmp.lt.u32.totalorder %s453_s15, %s596_s4 }
 0x1b1   :  { %p459_p11 = pnand %p457_p10, %p454_p9 }
 0x1b3   :  { %462 = shalt.err (!%p459_p11)
}
 0x1b4   :  { %274 = dma.vmem_to_hbm [thread:$0]  %s272_s12, 128, %s596_s4, [#allocation4]  }
 0x1b5   :  { %469 = dma.done.wait [#allocation4], 128  }
 0x1b6   :  { %470 = vsyncadd [#allocation4], 4294967168 }
 0x1b7   :  { %278 = vsyncpa [#allocation3], 1 }
 0x1b8   :  { %279 = vsyncpa [#allocation6], 1 }
 0x1b9   :  { %280 = vsyncpa [#allocation9], 1 }
 0x1ba   :  { %281 = vsyncpa [#allocation4], 1 }

</bundles_post_ra>
